<compile_context>
chip_gen: v7x
topology: tpu7x:2x2x1
jax: 0.10.0
libtpu: 0.0.40
codegen_flags: <defaults>
</compile_context>

<pallas_src>
import math

import jax
import jax.numpy as jnp
from jax import lax
from jax.experimental import pallas as pl
from jax.experimental.pallas import tpu as pltpu

D_MODEL = 64      # d_model of the (synthetic) BERT backbone
H1 = 128
H2 = 32
N_CLS = 14
OUT_PAD = 128     # lane-dense padded classifier width
LN_EPS = 1e-5     # PyTorch nn.LayerNorm default eps
NEG_BIG = -1e30   # padded-logit bias: exp(NEG_BIG) == 0 in f32


def _cdiv(a, b):
    return -(-a // b)


def _round_up(n, m):
    return ((n + m - 1) // m) * m


def _gelu_exact(x):
    # matches nn.GELU() default (erf-based, approximate='none')
    # TODO(synk): jax.nn.gelu(approximate=True) moves this to the EUP slot on
    # v6e/v7x if erf bit-parity is not required (numerics shift ~1e-3).
    return x * 0.5 * (1.0 + lax.erf(x / math.sqrt(2.0)))


def _layernorm_noaffine(x):
    # gamma/beta are folded into the *next* linear in the wrapper.  One-pass
    # variance keeps the two lane reductions independent (XLU latency); the
    # clamp guards the cancellation-negative case so rsqrt never NaNs.
    mean = jnp.mean(x, axis=-1, keepdims=True)
    msq = jnp.mean(x * x, axis=-1, keepdims=True)
    var = jnp.maximum(msq - mean * mean, 0.0)
    return (x - mean) * lax.rsqrt(var + LN_EPS)


def head_kernel(x_ref, w1_ref, b1_ref, w2_ref, b2_ref, w3_ref, b3_ref, o_ref):
    x = x_ref[...].astype(jnp.float32)                                  # (TB, XW)

    # fc1 + GELU + LayerNorm(128).  Rows of w1 beyond d_model are zero, so any
    # filler lanes in the fused-CLS input window are exactly ignored.
    h = jnp.dot(x, w1_ref[...], preferred_element_type=jnp.float32) + b1_ref[...]
    h = _layernorm_noaffine(_gelu_exact(h))                              # (TB, 128)

    # fc2 (LayerNorm1 affine folded in) + GELU + LayerNorm(32)
    h = jnp.dot(h, w2_ref[...], preferred_element_type=jnp.float32) + b2_ref[...]
    h = _layernorm_noaffine(_gelu_exact(h))                              # (TB, 32)

    # fc3 (LayerNorm2 affine folded in; lane-dense 128 classes, pad columns
    # carry weight 0 and bias -1e30 so exp underflows to exactly 0) + naive
    # softmax exactly like the reference `softmax` (no max subtraction).
    logits = jnp.dot(h, w3_ref[...], preferred_element_type=jnp.float32) + b3_ref[...]
    e = jnp.exp(logits)                                                  # (TB, 128)
    s = jnp.sum(e, axis=-1, keepdims=True)
    o_ref[...] = e * pl.reciprocal(s, approx=True)                       # EUP vrcp


def _choose_batch_tiling(B, max_rows_per_tile):
    # Enough steps to respect the VMEM cap, and at least min(4, cdiv(B, 8))
    # steps so v7x's two TensorCores both get work when B is large.  TB is
    # derived from cdiv(B, n_steps) so padding waste stays < n_steps * 8 rows.
    n_steps = max(_cdiv(B, max_rows_per_tile), min(4, _cdiv(B, 8)), 1)
    tb = _round_up(_cdiv(B, n_steps), 8)
    n_steps = _cdiv(B, tb)
    return tb, tb * n_steps, n_steps


def fine_tune_bert_forward(in_put, params, *, max_rows_per_tile=2048):
    """in_put: (B, S, d_model) float. Returns (B, 14) softmax probabilities."""
    B, S, D = in_put.shape
    TB, Bp, n_steps = _choose_batch_tiling(B, max_rows_per_tile)

    w1, b1, g1, be1, w2, b2, g2, be2, w3, b3 = params
    f32 = jnp.float32

    # --- CLS-token input.  Fused path: no padding needed and the flattened
    # row width divides evenly into lane-dense 128-wide windows -> read the
    # CLS token straight out of HBM via the input BlockSpec (no intermediate).
    # Fallback: XLA CLS slice + cheap (B, d_model) pad.
    XW = _round_up(D, 128)
    fused_cls = (Bp == B) and (S * D) >= XW and (S * D) % XW == 0
    if fused_cls:
        x = in_put.reshape(B, S * D)        # metadata-only view of contiguous input
        x_spec = pl.BlockSpec((TB, XW), lambda i: (i, 0))
    else:
        XW = D
        x = in_put[:, 0, :]
        if Bp != B:
            x = jnp.pad(x, ((0, Bp - B), (0, 0)))
        x_spec = pl.BlockSpec((TB, D), lambda i: (i, 0))

    # fc1 weight zero-padded to the x block width (extra rows hit the
    # zero-weighted filler lanes of the fused CLS window).
    w1e = jnp.zeros((XW, H1), f32).at[:D, :].set(w1.T.astype(f32))
    b1e = b1.astype(f32).reshape(1, H1)

    # Fold LayerNorm1 affine into fc2:  (h*g1 + be1) @ W2^T + b2
    w2t = w2.T.astype(f32)
    w2e = g1.astype(f32)[:, None] * w2t
    b2e = (b2.astype(f32) + be1.astype(f32) @ w2t).reshape(1, H2)

    # Fold LayerNorm2 affine into fc3.  Pad columns of w3 stay exactly 0 and
    # pad bias stays exactly -1e30 so they cannot corrupt the softmax sum.
    w3t = jnp.zeros((H2, OUT_PAD), f32).at[:, :N_CLS].set(w3.T.astype(f32))
    w3e = g2.astype(f32)[:, None] * w3t
    b3e = jnp.full((1, OUT_PAD), NEG_BIG, f32).at[0, :N_CLS].set(
        b3.astype(f32) + be2.astype(f32) @ w3.T.astype(f32))

    row = lambda i: (i, 0)     # batch-tiled arrays follow the grid
    const = lambda i: (0, 0)   # weights/biases: same block every step (VMEM-resident)

    grid_spec = pltpu.PrefetchScalarGridSpec(
        num_scalar_prefetch=0,
        grid=(n_steps,),
        in_specs=[
            x_spec,
            pl.BlockSpec((XW, H1), const),
            pl.BlockSpec((1, H1), const),
            pl.BlockSpec((H1, H2), const),
            pl.BlockSpec((1, H2), const),
            pl.BlockSpec((H2, OUT_PAD), const),
            pl.BlockSpec((1, OUT_PAD), const),
        ],
        out_specs=pl.BlockSpec((TB, OUT_PAD), row),
    )

    out_padded = pl.pallas_call(
        head_kernel,
        out_shape=jax.ShapeDtypeStruct((Bp, OUT_PAD), jnp.float32),
        grid_spec=grid_spec,
        compiler_params=pltpu.CompilerParams(
            # Rows are independent: shard the batch grid across v7x's two
            # TensorCores (neutral on single-TC v5e/v6e).
            dimension_semantics=("parallel",)),
    )(x, w1e, b1e, w2e, b2e, w3e, b3e)

    return out_padded[:B, :N_CLS]


def _reference_forward(in_put, params):
    """Pure-JAX reference mirroring the PyTorch head (for correctness check)."""
    w1, b1, g1, be1, w2, b2, g2, be2, w3, b3 = params
    x = in_put[:, 0, :].astype(jnp.float32)

    def ln(v, g, b):
        m = jnp.mean(v, axis=-1, keepdims=True)
        var = jnp.mean((v - m) ** 2, axis=-1, keepdims=True)
        return (v - m) / jnp.sqrt(var + LN_EPS) * g + b

    h = ln(_gelu_exact(x @ w1.T + b1), g1, be1)
    h = ln(_gelu_exact(h @ w2.T + b2), g2, be2)
    logits = h @ w3.T + b3
    e = jnp.exp(logits)
    return e / jnp.sum(e, axis=1, keepdims=True)


def init_params(key):
    """Deterministic synthetic parameters matching fine_tuneBERT.__init__ shapes.

    LayerNorm gamma/beta default to ones/zeros in the PyTorch module; a small
    deterministic perturbation is used here so the LN-affine -> linear fold is
    actually exercised by the correctness check.
    """
    ks = jax.random.split(key, 10)
    w1 = jax.random.normal(ks[0], (H1, D_MODEL), jnp.float32)   # fc1.weight ~ randn(128, d_model)
    b1 = jax.random.normal(ks[1], (H1,), jnp.float32)           # fc1.bias   ~ randn(128)
    w2 = jax.random.normal(ks[2], (H2, H1), jnp.float32)        # fc2.weight ~ randn(32, 128)
    b2 = jax.random.normal(ks[3], (H2,), jnp.float32)           # fc2.bias   ~ randn(32)
    w3 = jax.random.normal(ks[4], (N_CLS, H2), jnp.float32)     # fc3.weight ~ randn(14, 32)
    b3 = jax.random.normal(ks[5], (N_CLS,), jnp.float32)        # fc3.bias   ~ randn(14)
    g1 = 1.0 + 0.05 * jax.random.normal(ks[6], (H1,), jnp.float32)
    be1 = 0.05 * jax.random.normal(ks[7], (H1,), jnp.float32)
    g2 = 1.0 + 0.05 * jax.random.normal(ks[8], (H2,), jnp.float32)
    be2 = 0.05 * jax.random.normal(ks[9], (H2,), jnp.float32)
    return (w1, b1, g1, be1, w2, b2, g2, be2, w3, b3)


if __name__ == "__main__":
    key = jax.random.PRNGKey(0)
    k_in1, k_in2, k_par = jax.random.split(key, 3)

    params = init_params(k_par)
    fwd = jax.jit(fine_tune_bert_forward)

    S = 8

    # Case 1: small ragged batch -> XLA CLS slice + padded tile, grid=(1,).
    B1 = 2
    x1 = jax.random.normal(k_in1, (B1, S, D_MODEL), jnp.float32)
    out1 = jax.block_until_ready(fwd(x1, params))
    ref1 = _reference_forward(x1, params)
    assert out1.shape == (B1, N_CLS), out1.shape
    assert bool(jnp.all(jnp.isfinite(out1)))
    assert bool(jnp.allclose(out1, ref1, atol=2e-3, rtol=2e-3)), (out1, ref1)

    # Case 2: tile-divisible batch -> fused-CLS BlockSpec path, 2 grid steps.
    B2 = 16
    x2 = jax.random.normal(k_in2, (B2, S, D_MODEL), jnp.float32)
    out2 = jax.block_until_ready(fwd(x2, params))
    ref2 = _reference_forward(x2, params)
    assert out2.shape == (B2, N_CLS), out2.shape
    assert bool(jnp.all(jnp.isfinite(out2)))
    assert bool(jnp.allclose(out2, ref2, atol=2e-3, rtol=2e-3)), (out2, ref2)

    print("KERNEL_OK")
</pallas_src>

<mosaic_0001>
module attributes {stable_mosaic.version = 11 : i64} {
  func.func @head_kernel(%arg0: i32, %arg1: memref<8x64xf32, #tpu.memory_space<vmem>>, %arg2: memref<64x128xf32, #tpu.memory_space<vmem>>, %arg3: memref<1x128xf32, #tpu.memory_space<vmem>>, %arg4: memref<128x32xf32, #tpu.memory_space<vmem>>, %arg5: memref<1x32xf32, #tpu.memory_space<vmem>>, %arg6: memref<32x128xf32, #tpu.memory_space<vmem>>, %arg7: memref<1x128xf32, #tpu.memory_space<vmem>>, %arg8: memref<8x128xf32, #tpu.memory_space<vmem>>) attributes {dimension_semantics = [#tpu.dimension_semantics<parallel>], iteration_bounds = array<i64: 1>, scalar_prefetch = 0 : i64, scratch_operands = 0 : i64, tpu.core_type = #tpu.core_type<tc>, window_params = [{transform_indices = @transform_0, window_bounds = array<i64: 8, 64>}, {pipeline_mode = #tpu.pipeline_mode<synchronous>, transform_indices = @transform_1, window_bounds = array<i64: 64, 128>}, {pipeline_mode = #tpu.pipeline_mode<synchronous>, transform_indices = @transform_2, window_bounds = array<i64: 1, 128>}, {pipeline_mode = #tpu.pipeline_mode<synchronous>, transform_indices = @transform_3, window_bounds = array<i64: 128, 32>}, {pipeline_mode = #tpu.pipeline_mode<synchronous>, transform_indices = @transform_4, window_bounds = array<i64: 1, 32>}, {pipeline_mode = #tpu.pipeline_mode<synchronous>, transform_indices = @transform_5, window_bounds = array<i64: 32, 128>}, {pipeline_mode = #tpu.pipeline_mode<synchronous>, transform_indices = @transform_6, window_bounds = array<i64: 1, 128>}, {transform_indices = @transform_7, window_bounds = array<i64: 8, 128>}]} {
    %c0 = arith.constant 0 : index
    %c0_0 = arith.constant 0 : index
    %0 = vector.load %arg1[%c0, %c0_0] : memref<8x64xf32, #tpu.memory_space<vmem>>, vector<8x64xf32>
    %c0_1 = arith.constant 0 : index
    %c0_2 = arith.constant 0 : index
    %1 = vector.load %arg2[%c0_1, %c0_2] : memref<64x128xf32, #tpu.memory_space<vmem>>, vector<64x128xf32>
    %cst = arith.constant dense<0.000000e+00> : vector<8x128xf32>
    %2 = tpu.matmul %0, %1, %cst {dimension_numbers = #tpu.dot_dimension_numbers<[1], [0], [0], [1], [0, 0, 1, 1], [], []>} : vector<8x64xf32>, vector<64x128xf32>, vector<8x128xf32> -> vector<8x128xf32>
    %c0_3 = arith.constant 0 : index
    %c0_4 = arith.constant 0 : index
    %3 = vector.load %arg3[%c0_3, %c0_4] : memref<1x128xf32, #tpu.memory_space<vmem>>, vector<1x128xf32>
    %4 = vector.broadcast %3 : vector<1x128xf32> to vector<8x128xf32>
    %5 = arith.addf %2, %4 : vector<8x128xf32>
    %cst_5 = arith.constant 5.000000e-01 : f32
    %6 = vector.broadcast %cst_5 : f32 to vector<8x128xf32>
    %7 = arith.mulf %5, %6 : vector<8x128xf32>
    %cst_6 = arith.constant 1.41421354 : f32
    %8 = vector.broadcast %cst_6 : f32 to vector<8x128xf32>
    %9 = arith.divf %5, %8 : vector<8x128xf32>
    %10 = math.erf %9 : vector<8x128xf32>
    %cst_7 = arith.constant 1.000000e+00 : f32
    %11 = vector.broadcast %cst_7 : f32 to vector<8x128xf32>
    %12 = arith.addf %11, %10 : vector<8x128xf32>
    %13 = arith.mulf %7, %12 : vector<8x128xf32>
    %cst_8 = arith.constant dense<0.000000e+00> : vector<8xf32>
    %14 = vector.multi_reduction <add>, %13, %cst_8 [1] : vector<8x128xf32> to vector<8xf32>
    %15 = vector.shape_cast %14 : vector<8xf32> to vector<8x1xf32>
    %cst_9 = arith.constant 1.280000e+02 : f32
    %16 = vector.broadcast %cst_9 : f32 to vector<8x1xf32>
    %17 = arith.divf %15, %16 : vector<8x1xf32>
    %18 = arith.mulf %13, %13 : vector<8x128xf32>
    %cst_10 = arith.constant dense<0.000000e+00> : vector<8xf32>
    %19 = vector.multi_reduction <add>, %18, %cst_10 [1] : vector<8x128xf32> to vector<8xf32>
    %20 = vector.shape_cast %19 : vector<8xf32> to vector<8x1xf32>
    %cst_11 = arith.constant 1.280000e+02 : f32
    %21 = vector.broadcast %cst_11 : f32 to vector<8x1xf32>
    %22 = arith.divf %20, %21 : vector<8x1xf32>
    %23 = arith.mulf %17, %17 : vector<8x1xf32>
    %24 = arith.subf %22, %23 : vector<8x1xf32>
    %cst_12 = arith.constant 0.000000e+00 : f32
    %25 = vector.broadcast %cst_12 : f32 to vector<8x1xf32>
    %26 = arith.maximumf %24, %25 : vector<8x1xf32>
    %27 = vector.broadcast %17 : vector<8x1xf32> to vector<8x128xf32>
    %28 = arith.subf %13, %27 : vector<8x128xf32>
    %cst_13 = arith.constant 9.99999974E-6 : f32
    %29 = vector.broadcast %cst_13 : f32 to vector<8x1xf32>
    %30 = arith.addf %26, %29 : vector<8x1xf32>
    %31 = math.rsqrt %30 : vector<8x1xf32>
    %32 = vector.broadcast %31 : vector<8x1xf32> to vector<8x128xf32>
    %33 = arith.mulf %28, %32 : vector<8x128xf32>
    %c0_14 = arith.constant 0 : index
    %c0_15 = arith.constant 0 : index
    %34 = vector.load %arg4[%c0_14, %c0_15] : memref<128x32xf32, #tpu.memory_space<vmem>>, vector<128x32xf32>
    %cst_16 = arith.constant dense<0.000000e+00> : vector<8x32xf32>
    %35 = tpu.matmul %33, %34, %cst_16 {dimension_numbers = #tpu.dot_dimension_numbers<[1], [0], [0], [1], [0, 0, 1, 1], [], []>} : vector<8x128xf32>, vector<128x32xf32>, vector<8x32xf32> -> vector<8x32xf32>
    %c0_17 = arith.constant 0 : index
    %c0_18 = arith.constant 0 : index
    %36 = vector.load %arg5[%c0_17, %c0_18] : memref<1x32xf32, #tpu.memory_space<vmem>>, vector<1x32xf32>
    %37 = vector.broadcast %36 : vector<1x32xf32> to vector<8x32xf32>
    %38 = arith.addf %35, %37 : vector<8x32xf32>
    %cst_19 = arith.constant 5.000000e-01 : f32
    %39 = vector.broadcast %cst_19 : f32 to vector<8x32xf32>
    %40 = arith.mulf %38, %39 : vector<8x32xf32>
    %cst_20 = arith.constant 1.41421354 : f32
    %41 = vector.broadcast %cst_20 : f32 to vector<8x32xf32>
    %42 = arith.divf %38, %41 : vector<8x32xf32>
    %43 = math.erf %42 : vector<8x32xf32>
    %cst_21 = arith.constant 1.000000e+00 : f32
    %44 = vector.broadcast %cst_21 : f32 to vector<8x32xf32>
    %45 = arith.addf %44, %43 : vector<8x32xf32>
    %46 = arith.mulf %40, %45 : vector<8x32xf32>
    %cst_22 = arith.constant dense<0.000000e+00> : vector<8xf32>
    %47 = vector.multi_reduction <add>, %46, %cst_22 [1] : vector<8x32xf32> to vector<8xf32>
    %48 = vector.shape_cast %47 : vector<8xf32> to vector<8x1xf32>
    %cst_23 = arith.constant 3.200000e+01 : f32
    %49 = vector.broadcast %cst_23 : f32 to vector<8x1xf32>
    %50 = arith.divf %48, %49 : vector<8x1xf32>
    %51 = arith.mulf %46, %46 : vector<8x32xf32>
    %cst_24 = arith.constant dense<0.000000e+00> : vector<8xf32>
    %52 = vector.multi_reduction <add>, %51, %cst_24 [1] : vector<8x32xf32> to vector<8xf32>
    %53 = vector.shape_cast %52 : vector<8xf32> to vector<8x1xf32>
    %cst_25 = arith.constant 3.200000e+01 : f32
    %54 = vector.broadcast %cst_25 : f32 to vector<8x1xf32>
    %55 = arith.divf %53, %54 : vector<8x1xf32>
    %56 = arith.mulf %50, %50 : vector<8x1xf32>
    %57 = arith.subf %55, %56 : vector<8x1xf32>
    %cst_26 = arith.constant 0.000000e+00 : f32
    %58 = vector.broadcast %cst_26 : f32 to vector<8x1xf32>
    %59 = arith.maximumf %57, %58 : vector<8x1xf32>
    %60 = vector.broadcast %50 : vector<8x1xf32> to vector<8x32xf32>
    %61 = arith.subf %46, %60 : vector<8x32xf32>
    %cst_27 = arith.constant 9.99999974E-6 : f32
    %62 = vector.broadcast %cst_27 : f32 to vector<8x1xf32>
    %63 = arith.addf %59, %62 : vector<8x1xf32>
    %64 = math.rsqrt %63 : vector<8x1xf32>
    %65 = vector.broadcast %64 : vector<8x1xf32> to vector<8x32xf32>
    %66 = arith.mulf %61, %65 : vector<8x32xf32>
    %c0_28 = arith.constant 0 : index
    %c0_29 = arith.constant 0 : index
    %67 = vector.load %arg6[%c0_28, %c0_29] : memref<32x128xf32, #tpu.memory_space<vmem>>, vector<32x128xf32>
    %cst_30 = arith.constant dense<0.000000e+00> : vector<8x128xf32>
    %68 = tpu.matmul %66, %67, %cst_30 {dimension_numbers = #tpu.dot_dimension_numbers<[1], [0], [0], [1], [0, 0, 1, 1], [], []>} : vector<8x32xf32>, vector<32x128xf32>, vector<8x128xf32> -> vector<8x128xf32>
    %c0_31 = arith.constant 0 : index
    %c0_32 = arith.constant 0 : index
    %69 = vector.load %arg7[%c0_31, %c0_32] : memref<1x128xf32, #tpu.memory_space<vmem>>, vector<1x128xf32>
    %70 = vector.broadcast %69 : vector<1x128xf32> to vector<8x128xf32>
    %71 = arith.addf %68, %70 : vector<8x128xf32>
    %72 = math.exp %71 : vector<8x128xf32>
    %cst_33 = arith.constant dense<0.000000e+00> : vector<8xf32>
    %73 = vector.multi_reduction <add>, %72, %cst_33 [1] : vector<8x128xf32> to vector<8xf32>
    %74 = vector.shape_cast %73 : vector<8xf32> to vector<8x1xf32>
    %75 = tpu.reciprocal %74 {approx = true} : vector<8x1xf32> -> vector<8x1xf32>
    %76 = vector.broadcast %75 : vector<8x1xf32> to vector<8x128xf32>
    %77 = arith.mulf %72, %76 : vector<8x128xf32>
    %c0_34 = arith.constant 0 : index
    %c0_35 = arith.constant 0 : index
    %78 = vector.load %arg8[%c0_34, %c0_35] : memref<8x128xf32, #tpu.memory_space<vmem>>, vector<8x128xf32>
    tpu.vector_store %arg8[%c0_34, %c0_35], %77 {strides = array<i32>} : memref<8x128xf32, #tpu.memory_space<vmem>>, vector<8x128xf32>,
    return
  }
  func.func @transform_0(%arg0: i32) -> (i32, i32) {
    %c0_i32 = arith.constant 0 : i32
    %c0_i32_0 = arith.constant 0 : i32
    return %arg0, %c0_i32 : i32, i32
  }
  func.func @transform_1(%arg0: i32) -> (i32, i32) {
    %c0_i32 = arith.constant 0 : i32
    %c0_i32_0 = arith.constant 0 : i32
    %c0_i32_1 = arith.constant 0 : i32
    return %c0_i32, %c0_i32_0 : i32, i32
  }
  func.func @transform_2(%arg0: i32) -> (i32, i32) {
    %c0_i32 = arith.constant 0 : i32
    %c0_i32_0 = arith.constant 0 : i32
    %c0_i32_1 = arith.constant 0 : i32
    return %c0_i32, %c0_i32_0 : i32, i32
  }
  func.func @transform_3(%arg0: i32) -> (i32, i32) {
    %c0_i32 = arith.constant 0 : i32
    %c0_i32_0 = arith.constant 0 : i32
    %c0_i32_1 = arith.constant 0 : i32
    return %c0_i32, %c0_i32_0 : i32, i32
  }
  func.func @transform_4(%arg0: i32) -> (i32, i32) {
    %c0_i32 = arith.constant 0 : i32
    %c0_i32_0 = arith.constant 0 : i32
    %c0_i32_1 = arith.constant 0 : i32
    return %c0_i32, %c0_i32_0 : i32, i32
  }
  func.func @transform_5(%arg0: i32) -> (i32, i32) {
    %c0_i32 = arith.constant 0 : i32
    %c0_i32_0 = arith.constant 0 : i32
    %c0_i32_1 = arith.constant 0 : i32
    return %c0_i32, %c0_i32_0 : i32, i32
  }
  func.func @transform_6(%arg0: i32) -> (i32, i32) {
    %c0_i32 = arith.constant 0 : i32
    %c0_i32_0 = arith.constant 0 : i32
    %c0_i32_1 = arith.constant 0 : i32
    return %c0_i32, %c0_i32_0 : i32, i32
  }
  func.func @transform_7(%arg0: i32) -> (i32, i32) {
    %c0_i32 = arith.constant 0 : i32
    %c0_i32_0 = arith.constant 0 : i32
    return %arg0, %c0_i32 : i32, i32
  }
}

</mosaic_0001>

<bundles_post_ra>
// kernel: fine_tune_bert_forward.1
= control target key start
LH: loop header
LB: loop body
LE: loop exit
PB: predicated region body
PF: predicated region fallthrough
CT: control target
= control target key end

     0   :  { %v506_v0 = vmov 0.0|0.0   ;;  %vm507_vm0 = vmmov 0   ;;  %v508_v4 = vmov 0.0   ;;  %vm42_vm1 = vcmask 523264   ;;  %s668_s1 = inlined_call_operand.vmem [shape: f32[64,128], index: 1, kind: input, shape index: {}]   ;;  %s669_s0 = inlined_call_operand.vmem [shape: f32[8,64], index: 0, kind: input, shape index: {}]   ;;  %s670_s3 = inlined_call_operand.vmem [shape: f32[128,32], index: 3, kind: input, shape index: {}]   ;;  %s671_s2 = inlined_call_operand.vmem [shape: f32[1,128], index: 2, kind: input, shape index: {}]   ;;  %s672_s4 = inlined_call_operand.vmem [shape: f32[1,32], index: 4, kind: input, shape index: {}]   ;;  %s673_s5 = inlined_call_operand.vmem [shape: f32[32,128], index: 5, kind: input, shape index: {}]   ;;  %s674_s6 = inlined_call_operand.vmem [shape: f32[1,128], index: 6, kind: input, shape index: {}]   ;;  %s675_s7 = inlined_call_operand.vmem [shape: f32[8,128], index: 7, kind: output, shape index: {}]  }
   0x1   :  { %449 = vmatprep.subr.bf16.mxu0 %v506_v0  ;;  %v27_v1 = vld [vmem:[%s668_s1] sm:$0xff]  ;;  %v28_v2 = vld [vmem:[%s668_s1 + $0x8] sm:$0xff]  ;;  %v29_v3 = vld [vmem:[%s668_s1 + $0x10] sm:$0xff]  ;;  %400 = vmatprep.mubr.msk.f32.mxu0 %vm507_vm0, %v508_v4  ;;  %vm235_vm2 = vcmask 261120  }
   0x2   :  { %v450_v5 = vpack.c.bf16 %v28_v2, %v27_v1  ;;  %v30_v6 = vld [vmem:[%s668_s1 + $0x18] sm:$0xff]  ;;  %461 = vmatprep.subr.bf16.mxu1 %v506_v0  ;;  %435 = vmatprep.mubr.msk.f32.mxu1 %vm507_vm0, %v508_v4  ;;  %v31_v8 = vld [vmem:[%s668_s1 + $0x20] sm:$0xff]  ;;  %v32_v9 = vld [vmem:[%s668_s1 + $0x28] sm:$0xff] }
   0x3   :  { %v453_v7 = vpack.c.bf16 %v30_v6, %v29_v3  ;;  %v456_v10 = vpack.c.bf16 %v32_v9, %v31_v8  ;;  %v33_v11 = vld [vmem:[%s668_s1 + $0x30] sm:$0xff]  ;;  %v34_v12 = vld [vmem:[%s668_s1 + $0x38] sm:$0xff]  ;;  %v26_v14 = vld [vmem:[%s669_s0] sm:$0xff] }
   0x4   :  { %451 = vmatpush3.bf16.msra.mxu0 %v450_v5  ;;  %v459_v13 = vpack.c.bf16 %v34_v12, %v33_v11  ;;  %v137_v15 = vld [vmem:[%s670_s3] sm:$0xff]  ;;  %v138_v16 = vld [vmem:[%s670_s3 + $0x8] sm:$0xff]  ;;  %v139_v17 = vld [vmem:[%s670_s3 + $0x10] sm:$0xff] }
   0x5   :  { %452 = vmatprep.subr.bf16.mxu0 %v506_v0  ;;  %v462_v18 = vpack.c.bf16 %v138_v16, %v137_v15  ;;  %v140_v19 = vld [vmem:[%s670_s3 + $0x18] sm:$0xff]  ;;  %v348_v21 = vld [vmem:[%s671_s2] ss:$0 sm:$0xff]  ;;  %v142_v32 = vld [vmem:[%s670_s3 + $0x28] sm:$0xff] }
   0x6   :  { %v465_v20 = vpack.c.bf16 %v140_v19, %v139_v17  ;;  %v141_v31 = vld [vmem:[%s670_s3 + $0x20] sm:$0xff]  ;;  %v143_v34 = vld [vmem:[%s670_s3 + $0x30] sm:$0xff]  ;;  %v144_v35 = vld [vmem:[%s670_s3 + $0x38] sm:$0xff] }
   0x7   :  { %463 = vmatpush3.bf16.msra.mxu1 %v462_v18  ;;  %v468_v33 = vpack.c.bf16 %v142_v32, %v141_v31  ;;  %v471_v36 = vpack.c.bf16 %v144_v35, %v143_v34  ;;  %v145_v37 = vld [vmem:[%s670_s3 + $0x40] sm:$0xff]  ;;  %v146_v38 = vld [vmem:[%s670_s3 + $0x48] sm:$0xff]  ;;  %v147_v40 = vld [vmem:[%s670_s3 + $0x50] sm:$0xff] }
   0x8   :  { %454 = vmatpush3.bf16.msra.mxu0 %v453_v7  ;;  %464 = vmatprep.subr.bf16.mxu1 %v506_v0  ;;  %v474_v39 = vpack.c.bf16 %v146_v38, %v145_v37  ;;  %v148_v41 = vld [vmem:[%s670_s3 + $0x58] sm:$0xff]  ;;  %v149_v43 = vld [vmem:[%s670_s3 + $0x60] sm:$0xff]  ;;  %v150_v44 = vld [vmem:[%s670_s3 + $0x68] sm:$0xff] }
   0x9   :  { %455 = vmatprep.subr.bf16.mxu0 %v506_v0  ;;  %v477_v42 = vpack.c.bf16 %v148_v41, %v147_v40  ;;  %v480_v45 = vpack.c.bf16 %v150_v44, %v149_v43  ;;  %v151_v46 = vld [vmem:[%s670_s3 + $0x70] sm:$0xff]  ;;  %v152_v47 = vld [vmem:[%s670_s3 + $0x78] sm:$0xff]  ;;  %v350_v60 = vld [vmem:[%s672_s4] ss:$0 sm:$0xff] }
   0xa   :  { %v483_v48 = vpack.c.bf16 %v152_v47, %v151_v46  ;;  %v253_v9 = vld [vmem:[%s673_s5] sm:$0xff]  ;;  %v255_v11 = vld [vmem:[%s673_s5 + $0x10] sm:$0xff] }
   0xb   :  { %466 = vmatpush3.bf16.msra.mxu1 %v465_v20 }
   0xc   :  { %457 = vmatpush3.bf16.msra.mxu0 %v456_v10  ;;  %467 = vmatprep.subr.bf16.mxu1 %v506_v0  ;;  %v254_v10 = vld [vmem:[%s673_s5 + $0x8] sm:$0xff] }
   0xd   :  { %458 = vmatprep.subr.bf16.mxu0 %v506_v0  ;;  %v486_v12 = vpack.c.bf16 %v254_v10, %v253_v9 }
   0xf   :  { %469 = vmatpush3.bf16.msra.mxu1 %v468_v33 }
  0x10   :  { %460 = vmatpush3.bf16.msra.mxu0 %v459_v13  ;;  %470 = vmatprep.subr.bf16.mxu1 %v506_v0  ;;  %v256_v13 = vld [vmem:[%s673_s5 + $0x18] sm:$0xff] }
  0x11   :  { %485 = vmatprep.subr.bf16.mxu0 %v506_v0 }
  0x13   :  { %401 = vmatmul.mubr.msk.f32.vlgmr.msra.gmra.mrb[0].mxu0 %vm42_vm1, %v26_v14  ;;  %472 = vmatpush3.bf16.msra.mxu1 %v471_v36  ;;  %v489_v14 = vpack.c.bf16 %v256_v13, %v255_v11 }
  0x14   :  { %446 = vmatprep.mubr.msk.f32.mxu0 %vm507_vm0, %v508_v4  ;;  %473 = vmatprep.subr.bf16.mxu1 %v506_v0 }
  0x15   :  { %487 = vmatpush3.bf16.msra.mxu0 %v486_v12 }
  0x16   :  { %488 = vmatprep.subr.bf16.mxu0 %v506_v0 }
  0x17   :  { %475 = vmatpush3.bf16.msra.mxu1 %v474_v39 }
  0x18   :  { %476 = vmatprep.subr.bf16.mxu1 %v506_v0 }
  0x19   :  { %490 = vmatpush3.bf16.msra.mxu0 %v489_v14 }
  0x1b   :  { %478 = vmatpush3.bf16.msra.mxu1 %v477_v42 }
  0x1c   :  { %479 = vmatprep.subr.bf16.mxu1 %v506_v0 }
  0x1f   :  { %481 = vmatpush3.bf16.msra.mxu1 %v480_v45 }
  0x20   :  { %482 = vmatprep.subr.bf16.mxu1 %v506_v0 }
  0x23   :  { %484 = vmatpush3.bf16.msra.mxu1 %v483_v48 }
  0xe6   :  { %v112_v22 = vpop.f32.mrb[0].mxu0 }
  0xe7   :  { %v113_v23 = vadd.f32 %v348_v21, %v112_v22  ;;  %v402_v24 = vpop.f32.mrb[1].mxu0 }
  0xe9   :  { %v118_v25 = vmul.f32 0.70710677, %v113_v23  ;;  %v116_v27 = vmul.f32 0.5, %v113_v23 }
  0xeb   :  { %494 = verf.f32 %v118_v25 }
  0xf5   :  { %v495_v26 = vpop.eup %494 }
  0xf6   :  { %v120_v28 = vadd.f32 1.0, %v495_v26  ;;  %v351_v26 = vld [vmem:[%s674_s6] ss:$0 sm:$0xff] }
  0xf8   :  { %v121_v29 = vmul.f32 %v120_v28, %v116_v27 }
  0xfa   :  { %122 = vadd.xlane.f32.xlu0 %v121_v29  ;;  %v126_v30 = vmul.f32 %v121_v29, %v121_v29 }
  0xfe   :  { %127 = vadd.xlane.f32.xlu0 %v126_v30 }
 0x187   :  { %v123_v49 = vpop.xlane.xlu0 %122 }
 0x188   :  { %v125_v50 = vmul.f32 0.0078125, %v123_v49 }
 0x18a   :  { %v130_v52 = vmul.f32 %v125_v50, %v125_v50  ;;  %v133_v57 = vsub.f32 %v121_v29, %v125_v50 }
 0x18b   :  { %v128_v51 = vpop.xlane.xlu0 %127 }
 0x18c   :  { %v129_v53 = vmul.f32 0.0078125, %v128_v51 }
 0x18e   :  { %v131_v54 = vsub.f32 %v129_v53, %v130_v52 }
 0x190   :  { %v132_v55 = vmax.f32 %v131_v54, 0.0 }
 0x192   :  { %v134_v56 = vadd.f32 1e-05, %v132_v55 }
 0x194   :  { %496 = vrsqrt.f32 %v134_v56 }
 0x19e   :  { %v497_v58 = vpop.eup %496 }
 0x19f   :  { %v136_v59 = vmul.f32 %v497_v58, %v133_v57 }
 0x1a1   :  { %436 = vmatmul.mubr.f32.vlgmr.msra.gmra.mrb[0].mxu1 %v136_v59 }
 0x274   :  { %v226_v61 = vpop.f32.mrb[0].mxu1 }
 0x275   :  { %v227_v62 = vadd.f32 %v350_v60, %v226_v61  ;;  %v437_v63 = vpop.f32.mrb[1].mxu1 }
 0x277   :  { %v231_v1 = vmul.f32 0.70710677, %v227_v62  ;;  %v230_v3 = vmul.f32 0.5, %v227_v62 }
 0x279   :  { %498 = verf.f32 %v231_v1 }
 0x283   :  { %v499_v2 = vpop.eup %498 }
 0x284   :  { %v233_v4 = vadd.f32 1.0, %v499_v2 }
 0x286   :  { %v234_v5 = vmul.f32 %v233_v4, %v230_v3 }
 0x288   :  { %v236_v6 = vsel %vm235_vm2, %v234_v5, 0.0  ;;  %v241_v7 = vmul.f32 %v234_v5, %v234_v5 }
 0x289   :  { %237 = vadd.xlane.f32.xlu1 %v236_v6 }
 0x28a   :  { %v242_v8 = vsel %vm235_vm2, %v241_v7, 0.0 }
 0x28d   :  { %243 = vadd.xlane.f32.xlu1 %v242_v8 }
 0x316   :  { %v238_v15 = vpop.xlane.xlu1 %237 }
 0x317   :  { %v240_v16 = vmul.f32 0.03125, %v238_v15 }
 0x319   :  { %v246_v18 = vmul.f32 %v240_v16, %v240_v16  ;;  %v249_v23 = vsub.f32 %v234_v5, %v240_v16 }
 0x31a   :  { %v244_v17 = vpop.xlane.xlu1 %243 }
 0x31b   :  { %v245_v19 = vmul.f32 0.03125, %v244_v17 }
 0x31d   :  { %v247_v20 = vsub.f32 %v245_v19, %v246_v18 }
 0x31f   :  { %v248_v21 = vmax.f32 %v247_v20, 0.0 }
 0x321   :  { %v250_v22 = vadd.f32 1e-05, %v248_v21 }
 0x323   :  { %500 = vrsqrt.f32 %v250_v22 }
 0x32d   :  { %v501_v24 = vpop.eup %500 }
 0x32e   :  { %v252_v25 = vmul.f32 %v501_v24, %v249_v23 }
 0x330   :  { %447 = vmatmul.mubr.msk.f32.vlgmr.msra.gmra.mrb[2].mxu0 %vm235_vm2, %v252_v25 }
 0x403   :  { %v333_v0 = vpop.f32.mrb[2].mxu0 }
 0x404   :  { %v334_v27 = vadd.f32 %v351_v26, %v333_v0  ;;  %v448_v28 = vpop.f32.mrb[3].mxu0 }
 0x406   :  { %v337_v29 = vmul.f32 1.442695, %v334_v27 }
 0x408   :  { %502 = vpow2.f32 %v337_v29 }
 0x412   :  { %v503_v30 = vpop.eup %502 }
 0x413   :  { %339 = vadd.xlane.f32.xlu0 %v503_v30 }
 0x4a0   :  { %v340_v31 = vpop.xlane.xlu0 %339 }
 0x4a1   :  { %504 = vrcp.f32 %v340_v31 }
 0x4ab   :  { %v505_v32 = vpop.eup %504 }
 0x4ac   :  { %v342_v33 = vmul.f32 %v505_v32, %v503_v30 }
 0x4ae   :  { %343 = vst [vmem:[%s675_s7] sm:$0xff] %v342_v33 }

</bundles_post_ra>
